<compile_context>
chip_gen: v5e
topology: v5e:2x2
jax: 0.10.0
libtpu: 0.0.40
codegen_flags: <defaults>
</compile_context>

<pallas_src>
import functools
import math

import jax
import jax.numpy as jnp
from jax.experimental import pallas as pl
from jax.experimental.pallas import tpu as pltpu

_MIN_GRID_STEPS = 4  # aim for >= 2 grid steps per TensorCore on v7x megacore


def _round_up(x: int, m: int) -> int:
    return ((x + m - 1) // m) * m


def _sublane_tile(itemsize: int) -> int:
    # Second-minor VMEM tiling per dtype width: f32 -> 8, bf16 -> 16, int8/fp8 -> 32.
    return {4: 8, 2: 16, 1: 32}.get(itemsize, 8)


def make_positional_encoding(d_model: int, max_len: int = 5000,
                             dtype=jnp.float32) -> jnp.ndarray:
    """Buffer identical to the PyTorch __init__ (computed in f32).

    Build it in the activation dtype (dtype=...) so the forward never has to
    cast it per call.
    """
    position = jnp.arange(max_len, dtype=jnp.float32)[:, None]           # (max_len, 1)
    div_term = jnp.exp(jnp.arange(0, d_model, 2, dtype=jnp.float32)
                       * (-math.log(10000.0) / d_model))                 # (d_model//2,)
    angles = position * div_term                                         # (max_len, d_model//2)
    pe = jnp.zeros((max_len, 1, d_model), dtype=jnp.float32)
    pe = pe.at[:, 0, 0::2].set(jnp.sin(angles))
    pe = pe.at[:, 0, 1::2].set(jnp.cos(angles))
    return pe.astype(dtype)


# ---------------------------------------------------------------------------
# Kernels
# ---------------------------------------------------------------------------

def _pe_add_kernel_3d(x_ref, pe_ref, o_ref):
    # x_ref/o_ref: (tile_s, tile_b, D); pe_ref: (tile_s, 1, D).
    # pe broadcasts over the batch (sublane) axis inside the kernel; it is
    # never pre-broadcast in HBM.
    o_ref[...] = x_ref[...] + pe_ref[...]


def _pe_add_kernel_flat(x_ref, pe_ref, o_ref, *, batch):
    # x_ref/o_ref: (tile_s, B*D); pe_ref: (tile_s, D).
    # Row layout of x2d is [b0 d0..D-1 | b1 d0..D-1 | ...], so replicating pe
    # along the lane axis reproduces x[s, b, :] + pe[s] for every b.
    pe_row = pe_ref[...]
    if batch > 1:
        pe_row = jnp.concatenate([pe_row] * batch, axis=-1)   # lane-axis concat (XLU)
    o_ref[...] = x_ref[...] + pe_row


# ---------------------------------------------------------------------------
# Tile selection (padded-VMEM-byte accounting)
# ---------------------------------------------------------------------------

def _flat_tile_s(S, lane_width, itemsize, sub, target_bytes):
    """Rows per tile for the flattened [S, B*D] layout."""
    lane_bytes = _round_up(lane_width, 128) * itemsize        # padded bytes per row
    rows = max(1, target_bytes // lane_bytes)
    # Keep the grid multi-step when S allows (megacore), but never below one
    # sublane tile.
    rows = min(rows, max(sub, _round_up(pl.cdiv(S, _MIN_GRID_STEPS), sub)))
    if rows >= S:
        return S                                   # full extent is always legal
    return min(S, max(sub, (rows // sub) * sub))   # else multiple of sublane tile


def _tiles_3d(S, B, D, itemsize, sub, target_bytes):
    """(tile_s, tile_b) for the general [S, B, D] layout."""
    padded_d = _round_up(D, 128)
    slab_bytes = _round_up(B, sub) * padded_d * itemsize       # padded (1, B, D) slab
    if slab_bytes <= target_bytes:
        tile_b = B
        tile_s = max(1, target_bytes // slab_bytes)
    else:
        # A single (1, B, D) slab already exceeds the budget -> tile the batch.
        tile_s = 1
        tile_b = min(B, max(sub,
                            ((target_bytes // (padded_d * itemsize)) // sub) * sub))
    tile_s = int(min(tile_s, S, max(1, pl.cdiv(S, _MIN_GRID_STEPS))))
    return tile_s, int(tile_b)


def _vmem_kwargs(footprint_bytes: int, override):
    if override is not None:
        return {"vmem_limit_bytes": int(override)}
    if footprint_bytes > 12 * 1024 * 1024:
        # Would not fit v5e's 16 MiB scoped default once pipeline internals are
        # added; raise the limit to the actual padded need plus headroom.
        return {"vmem_limit_bytes": int(min(footprint_bytes + (8 << 20), 100 << 20))}
    return {}


# ---------------------------------------------------------------------------
# Forward
# ---------------------------------------------------------------------------

def positional_encoding_forward(x: jnp.ndarray, pe: jnp.ndarray, *,
                                target_tile_bytes: int = 2 * 1024 * 1024,
                                vmem_limit_bytes: int | None = None) -> jnp.ndarray:
    """x: [S, B, D]; pe: [max_len, 1, D] (ideally already in x.dtype).

    Returns x + pe[:S] (eval-mode dropout == identity).
    `target_tile_bytes` is the padded-VMEM budget of ONE x tile; total VMEM is
    ~4x that (double-buffered x + out) plus a small pe tile.
    """
    S, B, D = x.shape
    max_len = pe.shape[0]
    assert max_len >= S, f"seq_len {S} exceeds positional-encoding max_len {max_len}"
    assert pe.shape[1] == 1 and pe.shape[2] == D, "pe must be (max_len, 1, d_model)"
    if pe.dtype != x.dtype:
        # Avoid this per-call cast by building pe in the activation dtype at init.
        pe = pe.astype(x.dtype)

    itemsize = jnp.dtype(x.dtype).itemsize
    sub = _sublane_tile(itemsize)
    padded_d = _round_up(D, 128)

    if B < sub:
        # ---- Small-batch path: fold batch into the lane axis. ----------------
        lane_width = B * D
        tile_s = _flat_tile_s(S, lane_width, itemsize, sub, target_tile_bytes)
        grid = (pl.cdiv(S, tile_s),)

        # x / pe are contiguous, so these reshapes are free bitcasts under jit.
        x2d = x.reshape(S, lane_width)
        pe2d = pe.reshape(max_len, D)

        x_tile_padded = _round_up(tile_s, sub) * _round_up(lane_width, 128) * itemsize
        pe_tile_padded = _round_up(tile_s, sub) * padded_d * itemsize
        footprint = 4 * x_tile_padded + 2 * pe_tile_padded

        out2d = pl.pallas_call(
            functools.partial(_pe_add_kernel_flat, batch=B),
            out_shape=jax.ShapeDtypeStruct((S, lane_width), x.dtype),
            grid=grid,
            in_specs=[
                pl.BlockSpec((tile_s, lane_width), lambda i: (i, 0)),
                # Full pe buffer; the index_map does the [:S] slicing.  A
                # partial final S-tile may read pe rows >= S (< max_len); the
                # matching output rows are masked, so this is harmless.
                pl.BlockSpec((tile_s, D), lambda i: (i, 0)),
            ],
            out_specs=pl.BlockSpec((tile_s, lane_width), lambda i: (i, 0)),
            compiler_params=pltpu.CompilerParams(
                dimension_semantics=("parallel",),
                **_vmem_kwargs(footprint, vmem_limit_bytes)),
        )(x2d, pe2d)
        return out2d.reshape(S, B, D)

    # ---- General path: (tile_s, tile_b, D) blocks, pe kept (tile_s, 1, D). ----
    tile_s, tile_b = _tiles_3d(S, B, D, itemsize, sub, target_tile_bytes)
    grid = (pl.cdiv(S, tile_s), pl.cdiv(B, tile_b))

    x_tile_padded = tile_s * _round_up(tile_b, sub) * padded_d * itemsize
    pe_tile_padded = tile_s * sub * padded_d * itemsize
    footprint = 4 * x_tile_padded + 2 * pe_tile_padded

    return pl.pallas_call(
        _pe_add_kernel_3d,
        out_shape=jax.ShapeDtypeStruct((S, B, D), x.dtype),
        grid=grid,
        in_specs=[
            pl.BlockSpec((tile_s, tile_b, D), lambda i, j: (i, j, 0)),
            # pe ignores the batch grid axis -> fetched once per S-tile, reused
            # across all batch tiles, broadcast over sublanes inside the kernel.
            pl.BlockSpec((tile_s, 1, D), lambda i, j: (i, 0, 0)),
        ],
        out_specs=pl.BlockSpec((tile_s, tile_b, D), lambda i, j: (i, j, 0)),
        compiler_params=pltpu.CompilerParams(
            dimension_semantics=("parallel", "parallel"),
            **_vmem_kwargs(footprint, vmem_limit_bytes)),
    )(x, pe)


if __name__ == "__main__":
    key = jax.random.PRNGKey(0)

    # Case 1: small batch (B=2 < sublane tile) -> flattened [S, B*D] path.
    # D=128 keeps the output lane-dense; the multi-step cap forces a 3-step
    # grid so the pipelined path is exercised.
    S, B, D = 24, 2, 128
    pe = make_positional_encoding(D, max_len=64, dtype=jnp.float32)
    x = jax.random.normal(key, (S, B, D), dtype=jnp.float32)
    out = jax.block_until_ready(positional_encoding_forward(x, pe))
    ref = x + pe[:S]
    assert out.shape == (S, B, D)
    assert jnp.allclose(out, ref, atol=1e-6), "flat-path mismatch vs reference"

    # Case 2: batch >= sublane tile -> general 3-D (tile_s, tile_b, D) path.
    S2, B2, D2 = 16, 8, 128
    pe2 = make_positional_encoding(D2, max_len=32, dtype=jnp.float32)
    x2 = jax.random.normal(jax.random.PRNGKey(0), (S2, B2, D2), dtype=jnp.float32)
    out2 = jax.block_until_ready(positional_encoding_forward(x2, pe2))
    ref2 = x2 + pe2[:S2]
    assert out2.shape == (S2, B2, D2)
    assert jnp.allclose(out2, ref2, atol=1e-6), "3d-path mismatch vs reference"

    print("KERNEL_OK")
</pallas_src>

<mosaic_0001>
module attributes {stable_mosaic.version = 11 : i64} {
  func.func @_pe_add_kernel_flat(%arg0: i32, %arg1: memref<8x256xf32, #tpu.memory_space<vmem>>, %arg2: memref<8x128xf32, #tpu.memory_space<vmem>>, %arg3: memref<8x256xf32, #tpu.memory_space<vmem>>) attributes {dimension_semantics = [#tpu.dimension_semantics<parallel>], iteration_bounds = array<i64: 3>, scalar_prefetch = 0 : i64, scratch_operands = 0 : i64, tpu.core_type = #tpu.core_type<tc>, window_params = [{transform_indices = @transform_0, window_bounds = array<i64: 8, 256>}, {transform_indices = @transform_1, window_bounds = array<i64: 8, 128>}, {transform_indices = @transform_2, window_bounds = array<i64: 8, 256>}]} {
    %c0 = arith.constant 0 : index
    %c0_0 = arith.constant 0 : index
    %0 = vector.load %arg2[%c0, %c0_0] : memref<8x128xf32, #tpu.memory_space<vmem>>, vector<8x128xf32>
    %1 = tpu.concatenate %0, %0 in 1 : vector<8x128xf32>, vector<8x128xf32> -> vector<8x256xf32>
    %c0_1 = arith.constant 0 : index
    %c0_2 = arith.constant 0 : index
    %2 = vector.load %arg1[%c0_1, %c0_2] : memref<8x256xf32, #tpu.memory_space<vmem>>, vector<8x256xf32>
    %3 = arith.addf %2, %1 : vector<8x256xf32>
    %c0_3 = arith.constant 0 : index
    %c0_4 = arith.constant 0 : index
    %4 = vector.load %arg3[%c0_3, %c0_4] : memref<8x256xf32, #tpu.memory_space<vmem>>, vector<8x256xf32>
    tpu.vector_store %arg3[%c0_3, %c0_4], %3 {strides = array<i32>} : memref<8x256xf32, #tpu.memory_space<vmem>>, vector<8x256xf32>,
    return
  }
  func.func @transform_0(%arg0: i32) -> (i32, i32) {
    %c0_i32 = arith.constant 0 : i32
    %c0_i32_0 = arith.constant 0 : i32
    return %arg0, %c0_i32 : i32, i32
  }
  func.func @transform_1(%arg0: i32) -> (i32, i32) {
    %c0_i32 = arith.constant 0 : i32
    %c0_i32_0 = arith.constant 0 : i32
    return %arg0, %c0_i32 : i32, i32
  }
  func.func @transform_2(%arg0: i32) -> (i32, i32) {
    %c0_i32 = arith.constant 0 : i32
    %c0_i32_0 = arith.constant 0 : i32
    return %arg0, %c0_i32 : i32, i32
  }
}

</mosaic_0001>

<bundles_post_ra>
// kernel: tpu_custom_call.1
= control target key start
LH: loop header
LB: loop body
LE: loop exit
PB: predicated region body
PF: predicated region fallthrough
CT: control target
= control target key end

     0   :  { %7 = vsyncpa [#allocation3], 0  ;;  %s696_s0 = inlined_call_operand.hbm [shape: f32[24,256], index: 0, kind: input, shape index: {}]   ;;  %s697_s1 = inlined_call_operand.hbm [shape: f32[64,128], index: 1, kind: input, shape index: {}]   ;;  %s698_s2 = inlined_call_operand.hbm [shape: f32[24,256], index: 2, kind: output, shape index: {}]  }
   0x1   :  { %9 = vsyncpa [#allocation3 + $0x1], 0 }
   0x2   :  { %10 = vsyncpa [#allocation6], 0 }
   0x3   :  { %12 = vsyncpa [#allocation6 + $0x1], 0 }
   0x4   :  { %13 = vsyncpa [#allocation4], 0 }
   0x5   :  { %15 = vsyncpa [#allocation4 + $0x1], 0  ;;  %s535_s9 = smov 0   ;;  %s537_s10 = smov 0  }
   0x6   :  { %s539_s11 = smov 0   ;;  %s541_s12 = smov 0  }
   0x7 LB: > { %s556_s13 = sadd.s32 4294967295, %s518_s12   ;;  %s318_s14 = sadd.s32 4294967294, %s518_s12   ;;  %s518_s12 = sphi %s541_s12, %s708_s12   ;;  %s514_s11 = sphi %s539_s11, %s707_s11   ;;  %s510_s10 = sphi %s537_s10, %s706_s10   ;;  %s506_s9 = sphi %s535_s9, %s705_s9  }
   0x8   : > { %s560_s15 = sadd.s32 1, %s518_s12   ;;  %s28_s16 = sadd.s32 1, %s514_s11 }
   0x9   : > { %s25_s17 = ssub.s32 %s518_s12, %s560_s15  ;;  %p35_p0 = scmp.ne.s32.totalorder %s514_s11, %s510_s10 }
   0xa   : > { %p26_p1 = scmp.eq.s32.totalorder %s25_s17, 0  ;;  %p36_p2 = scmp.eq.s32.totalorder %s518_s12, 0 }
   0xb   : > { %p41_p3 = scmp.ne.s32.totalorder %s510_s10, %s506_s9  ;;  %p42_p4 = scmp.eq.s32.totalorder %s556_s13, 0 }
   0xc   : > { %s572_s18 = scalar_select %p26_p1, %s514_s11, %s28_s16  }
   0xd   : > { %p574_p5 = por %p36_p2, %p35_p0  ;;  %p578_p6 = por %p42_p4, %p41_p3 }
   0xe   : > { %p91_p7 = scmp.eq.s32.totalorder %s556_s13, 2  ;;  %p97_p8 = scmp.eq.s32.totalorder %s318_s14, 2 }
   0xf   : > { %p354_p9 = scmp.lt.s32.totalorder %s518_s12, 3  ;;  %s593_s23 = sand.u32 1, %s514_s11  }
  0x10   : > { %p584_p10 = por %p91_p7, %p35_p0  ;;  %p588_p11 = por %p97_p8, %p41_p3 }
  0x11   : > { %s335_s24 = sshll.u32 %s518_s12, 4  ;;  %s321_s25 = sshll.u32 %s593_s23, 4 }
  0x12   : > { %s126_s28 = scalar_lea.hbm %s696_s0, %s335_s24  ;;  %s121_s30 = scalar_lea.vmem [#allocation2], %s321_s25 }
  0x13   : > { %s128_s29 = sshll.u32 %s126_s28, 4  ;;  %s130_s3 = sshll.u32 %s121_s30, 4  ;;  %s129_s29 = int_to_ptr.hbm [resolvable:$true] %s128_s29  ;;  %s131_s3 = int_to_ptr.vmem [resolvable:$true] %s130_s3 }
  0x14   : > { %p602_p12 = pnand %p354_p9, %p574_p5  ;;  %p326_p13 = scmp.ge.s32.totalorder %s518_s12, 1 }
  0x15   : > { %p154_p0 = scmp.lt.s32.totalorder %s518_s12, 4  ;;  %s324_s5 = sshll.u32 %s593_s23, 3 }
  0x16   : > { %s118_s6 = scalar_lea.sflag [#allocation3], %s593_s23  ;;  %s388_s7 = sshra.s32 %s129_s29, 4  ;;  %s389_s7 = int_to_ptr.hbm [resolvable:$true] %s388_s7 }
  0x17   : > { %s390_s8 = scalar_lea.hbm %s389_s7, 16  ;;  %p392_p2 = pneg %p602_p12 }
  0x18   : > { %p391_p1 = scmp.ne.s32.totalorder %s389_s7, %s390_s8  ;;  %s395_s17 = scalar_lea.hbm %s696_s0, 48 }
  0x19   : > { %p396_p5 = scmp.lt.s32.totalorder %s389_s7, %s696_s0  ;;  %p397_p7 = scmp.lt.s32.totalorder %s395_s17, %s390_s8 }
  0x1a   : > { %p393_p3 = pnand %p392_p2, %p391_p1 }
  0x1b   : > { %p398_p8 = por %p397_p7, %p396_p5 }
  0x1c   : > { %p394_p4 = pneg %p393_p3 }
  0x1e   : > { %p399_p9 = pnand %p398_p8, %p394_p4 }
  0x20   : > { %402 = shalt.err (!%p399_p9)
}
  0x21   : > { %346 = dma.hbm_to_vmem [thread:$0]  (!%p602_p12), %s129_s29, 256, %s131_s3, %s118_s6  }
  0x22   : > { %p627_p1 = pnand %p326_p13, %p154_p0  ;;  %s325_s26 = sshll.u32 %s518_s12, 3 }
  0x23   : > { %s141_s27 = scalar_lea.vmem [#allocation5], %s324_s5  ;;  %s145_s8 = scalar_lea.hbm %s697_s1, %s325_s26 }
  0x24   : > { %s149_s28 = sshll.u32 %s141_s27, 4  ;;  %s147_s14 = sshll.u32 %s145_s8, 4  ;;  %s150_s28 = int_to_ptr.vmem [resolvable:$true] %s149_s28  ;;  %s148_s14 = int_to_ptr.hbm [resolvable:$true] %s147_s14 }
  0x25   : > { %s138_s16 = scalar_lea.sflag [#allocation6], %s593_s23  ;;  %s418_s17 = sshra.s32 %s148_s14, 4  ;;  %s419_s17 = int_to_ptr.hbm [resolvable:$true] %s418_s17 }
  0x26   : > { %s420_s29 = scalar_lea.hbm %s419_s17, 8  ;;  %s425_s5 = scalar_lea.hbm %s697_s1, 64 }
  0x27   : > { %p421_p3 = scmp.ne.s32.totalorder %s419_s17, %s420_s29  ;;  %p426_p4 = scmp.lt.s32.totalorder %s419_s17, %s697_s1 }
  0x28   : > { %p427_p5 = scmp.lt.s32.totalorder %s425_s5, %s420_s29 }
  0x29   : > { %p423_p13 = pnand %p421_p3, %p392_p2 }
  0x2a   : > { %p428_p7 = por %p427_p5, %p426_p4 }
  0x2b   : > { %p424_p0 = pneg %p423_p13 }
  0x2d   : > { %p429_p8 = pnand %p428_p7, %p424_p0 }
  0x2f   : > { %432 = shalt.err (!%p429_p8)
}
  0x30   : > { %349 = dma.hbm_to_vmem [thread:$0]  (!%p602_p12), %s148_s14, 128, %s150_s28, %s138_s16  }
  0x31   : > { %158 = sbr.rel (%p627_p1) target bundleno = 73 (0x49), region = 28  ;;  %s650_s23 = sand.u32 (!%p627_p1), 1, %s510_s10  }
  0x32   : > { %s327_s26 = sshll.u32 (!%p627_p1), %s650_s23, 4  ;;  %s161_s27 = scalar_lea.sflag (!%p627_p1), [#allocation3], %s650_s23 }
  0x33   : > { %s164_s30 = scalar_lea.vmem (!%p627_p1), [#allocation2], %s327_s26 }
  0x36   : > { %493 = dma.done.wait (%p578_p6), %s161_s27, 256  }
  0x37   : > { %495 = vsyncadd (%p578_p6), %s161_s27, 4294967040  ;;  %s328_s4 = sshll.u32 %s650_s23, 3  ;;  %s171_s25 = scalar_lea.sflag [#allocation6], %s650_s23 }
  0x38   : > { %s174_s28 = scalar_lea.vmem [#allocation5], %s328_s4 }
  0x39   : > { %497 = dma.done.wait (%p578_p6), %s171_s25, 128  }
  0x3a   : > { %499 = vsyncadd (%p578_p6), %s171_s25, 4294967168  ;;  %s336_s7 = sshll.u32 %s556_s13, 4  ;;  %s200_s17 = scalar_lea.vmem [#allocation7], %s327_s26  ;;  %v201_v0 = vld [vmem:[%s174_s28] sm:$0xff]  ;;  %v203_v2 = vld [vmem:[%s164_s30 + $0x8] sm:$0xff] }
  0x3b   : > { %s220_s16 = scalar_lea.hbm %s698_s2, %s336_s7  ;;  %s222_s29 = sshll.u32 %s200_s17, 4  ;;  %v202_v1 = vld [vmem:[%s164_s30] sm:$0xff]  ;;  %v205_v4 = vadd.f32 %v203_v2, %v201_v0  ;;  %s223_s29 = int_to_ptr.vmem [resolvable:$true] %s222_s29 }
  0x3c   : > { %s224_s3 = sshll.u32 %s220_s16, 4  ;;  %v204_v3 = vadd.f32 %v202_v1, %v201_v0  ;;  %s209_s20 = scalar_lea.sflag [#allocation4], %s650_s23  ;;  %s225_s3 = int_to_ptr.hbm [resolvable:$true] %s224_s3 }
  0x3d   : > { %207 = vst [vmem:[%s200_s17 + $0x8] sm:$0xff] %v205_v4  ;;  %s462_s6 = sshra.s32 %s225_s3, 4  ;;  %s468_s24 = scalar_lea.hbm %s698_s2, 48  ;;  %s463_s6 = int_to_ptr.hbm [resolvable:$true] %s462_s6 }
  0x3e   : > { %206 = vst [vmem:[%s200_s17] sm:$0xff] %v204_v3  ;;  %s464_s13 = scalar_lea.hbm %s463_s6, 16  ;;  %p469_p9 = scmp.lt.s32.totalorder %s463_s6, %s698_s2 }
  0x3f   : > { %p465_p6 = scmp.ne.s32.totalorder %s463_s6, %s464_s13  ;;  %p470_p1 = scmp.lt.s32.totalorder %s468_s24, %s464_s13 }
  0x41   : > { %p466_p12 = pnand %p465_p6, %p584_p10  ;;  %p471_p3 = por %p470_p1, %p469_p9 }
  0x43   : > { %p467_p2 = pneg %p466_p12 }
  0x45   : > { %p472_p13 = pnand %p471_p3, %p467_p2 }
  0x47   : > { %475 = shalt.err (!%p472_p13)
}
  0x48   : > { %341 = dma.vmem_to_hbm [thread:$0]  (%p584_p10), %s223_s29, 256, %s225_s3, %s209_s20  }
  0x49 PF: > { %p355_p0 = scmp.ge.s32.totalorder %s518_s12, 2  ;;  %s236_s23 = sand.u32 1, %s506_s9  }
  0x4a   : > { %s237_s30 = scalar_lea.sflag [#allocation4], %s236_s23 }
  0x4b   : > { %p351_p4 = pnand %p355_p0, %p588_p11 }
  0x4d   : > { %p352_p5 = pneg %p351_p4 }
  0x4f   : > { %501 = dma.done.wait (%p352_p5), %s237_s30, 256  }
  0x50   : > { %503 = vsyncadd (%p352_p5), %s237_s30, 4294967040  ;;  %p18_p7 = scmp.ge.s32.totalorder %s560_s15, 5   ;;  %s705_s9 = smov %s510_s10 }
  0x51   : > { %s706_s10 = smov %s514_s11  ;;  %s707_s11 = smov %s572_s18 }
  0x52   : > { %s708_s12 = smov %s560_s15  ;;  %20 = sbr.rel (!%p18_p7) target bundleno = 7 (0x7), region = 86 }
  0x57   :  { %243 = vsyncpa [#allocation3], 1 }
  0x58   :  { %245 = vsyncpa [#allocation3 + $0x1], 1 }
  0x59   :  { %246 = vsyncpa [#allocation6], 1 }
  0x5a   :  { %248 = vsyncpa [#allocation6 + $0x1], 1 }
  0x5b   :  { %249 = vsyncpa [#allocation4], 1 }
  0x5c   :  { %251 = vsyncpa [#allocation4 + $0x1], 1 }

</bundles_post_ra>
